<compile_context>
chip_gen: v6e
topology: v6e:2x2x1
jax: 0.10.0
libtpu: 0.0.40
codegen_flags: <defaults>
</compile_context>

<pallas_src>
import functools

import jax
import jax.numpy as jnp
from jax import lax
from jax.experimental import pallas as pl
from jax.experimental.pallas import tpu as pltpu


def _round_up(a, b):
    return -(-a // b) * b


_MAX_THW = 16384  # cap the statically-unrolled slab loop at 128 lane-slabs


def _se_kernel(x_ref, w1_ref, w2_ref, o_ref, acc_ref, *,
               hw, thw, inv_hw, mask_tail):
    # x_ref  : (tn, C, thw)  streamed input chunk (native dtype, bf16 OK)
    # w1_ref : (Cr, C)       fc1.weight (PyTorch layout, no bias) -- resident
    # w2_ref : (C, Cr)       fc2.weight (PyTorch layout, no bias) -- resident
    # o_ref  : (tn, C)       sigmoid gate (f32); written only at finalize
    # acc_ref: (tn, C, 128)  f32 lane-shaped accumulator, resident across k
    k = pl.program_id(1)
    nk = pl.num_programs(1)

    @pl.when(k == 0)
    def _init():
        acc_ref[...] = jnp.zeros_like(acc_ref)

    n_full = thw // 128
    rem = thw - n_full * 128

    def accumulate(mask):
        # Streaming phase: pure VPU adds over 128-lane slabs (no XLU in the
        # inner loop); the bf16->f32 upcast happens in-vreg after the DMA.
        if mask:
            lane_iota = lax.broadcasted_iota(jnp.int32, acc_ref.shape, 2)
            base = k * thw
        for j in range(n_full):
            x = x_ref[:, :, j * 128:(j + 1) * 128].astype(jnp.float32)
            if mask:
                pos = base + j * 128 + lane_iota
                x = jnp.where(pos < hw, x, 0.0)
            acc_ref[...] += x
        if rem:
            # Only reachable when thw == HW (single k step) -> no mask needed;
            # the untouched lanes of acc stay zero from the init.
            x = x_ref[:, :, n_full * 128:thw].astype(jnp.float32)
            acc_ref[:, :, :rem] += x

    if mask_tail:
        @pl.when(k < nk - 1)
        def _body():
            accumulate(False)

        @pl.when(k == nk - 1)
        def _tail():
            accumulate(True)
    else:
        accumulate(False)

    @pl.when(k == nk - 1)
    def _finalize():
        # Single cross-lane reduce per i-tile, off the streaming loop.
        pooled = jnp.sum(acc_ref[...], axis=-1) * inv_hw            # (tn, C)
        # fc1: (tn, C) . (Cr, C), contracting C  -> (tn, Cr)
        h = lax.dot_general(pooled, w1_ref[...],
                            dimension_numbers=(((1,), (1,)), ((), ())),
                            preferred_element_type=jnp.float32)
        h = jnp.maximum(h, 0.0)                                     # ReLU
        # fc2: (tn, Cr) . (C, Cr), contracting Cr -> (tn, C)
        s = lax.dot_general(h, w2_ref[...],
                            dimension_numbers=(((1,), (1,)), ((), ())),
                            preferred_element_type=jnp.float32)
        o_ref[...] = jax.nn.sigmoid(s).astype(o_ref.dtype)          # Sigmoid


def _pick_tiles(N, C, HW, itemsize, *, step_budget_bytes):
    """Pick (tn, thw) by GROWING toward the per-step budget."""
    # N tile: full-dim escape for small batches -- never stream padded rows.
    tn = N if N < 8 else 8

    # Lane (HW) tile: the contiguous axis in HBM.  Whole row if it fits,
    # otherwise the largest 128-multiple within budget, never below ~1 KiB
    # contiguous runs.
    min_run = max(128, _round_up(max(1, 1024 // itemsize), 128))
    fits_whole = tn * C * HW * itemsize <= step_budget_bytes
    if HW <= min_run or (fits_whole and HW <= _MAX_THW):
        thw = HW
    else:
        thw = (step_budget_bytes // (tn * C * itemsize)) // 128 * 128
        thw = max(min_run, min(thw, _MAX_THW))

    # Grow the N tile toward the budget (multiples of 8), but keep >= 2
    # i-tiles whenever N > 8 so v7x can shard the parallel axis over 2 TCs.
    if N >= 8:
        tn_cap = 8 if N == 8 else 8 * ((N + 15) // 16)
        while (tn + 8 <= tn_cap
               and (tn + 8) * C * thw * itemsize <= step_budget_bytes):
            tn += 8
    return tn, thw


def se_block(x_nchw, w1, w2, *, step_budget_bytes=4 * 1024 * 1024):
    """SE gate: global-avg-pool over (H, W) -> fc1 -> ReLU -> fc2 -> sigmoid.

    x_nchw: (N, C, H, W), any float dtype (streamed natively, no upcast copy);
    w1: (C//16, C); w2: (C, C//16) in PyTorch nn.Linear layout.
    Returns the (N, C, 1, 1) gate in float32."""
    N, C, H, W = x_nchw.shape
    Cr = w1.shape[0]
    HW = H * W
    itemsize = x_nchw.dtype.itemsize
    x3 = x_nchw.reshape(N, C, HW)        # no dtype cast, no padded copy

    tn, thw = _pick_tiles(N, C, HW, itemsize,
                          step_budget_bytes=step_budget_bytes)
    ni = pl.cdiv(N, tn)
    nk = pl.cdiv(HW, thw)
    mask_tail = (HW % thw) != 0
    assert not (mask_tail and thw % 128 != 0)

    # VMEM footprint: double-buffered x stream + lane accumulator + weights
    # + output block.  Explicit limit stays above the footprint on every
    # generation and <= 48 MiB so it is also safe on v7x (64 MiB physical).
    step_bytes = tn * C * thw * itemsize
    footprint = (2 * step_bytes
                 + tn * C * 128 * 4
                 + 2 * 2 * C * Cr * 4
                 + 2 * tn * C * 4)
    vmem_limit = int(min(48 * 1024 * 1024,
                         max(24 * 1024 * 1024, footprint + 8 * 1024 * 1024)))

    out = pl.pallas_call(
        functools.partial(_se_kernel, hw=HW, thw=thw, inv_hw=1.0 / HW,
                          mask_tail=mask_tail),
        out_shape=jax.ShapeDtypeStruct((N, C), jnp.float32),
        grid_spec=pltpu.PrefetchScalarGridSpec(
            num_scalar_prefetch=0,
            grid=(ni, nk),
            in_specs=[
                # Streamed input; double-buffered by Pallas.  (Per review:
                # pipeline_mode=pl.Buffered(3) is a profile-gated follow-up
                # if DMA is still exposed between steps on v7x.)
                pl.BlockSpec((tn, C, thw), lambda i, k: (i, 0, k)),
                # Weights: constant block index -> fetched once, resident.
                pl.BlockSpec((Cr, C), lambda i, k: (0, 0)),
                pl.BlockSpec((C, Cr), lambda i, k: (0, 0)),
            ],
            # Constant along the HW-reduction axis -> no per-step writeback;
            # written only from the finalize branch.
            out_specs=pl.BlockSpec((tn, C), lambda i, k: (i, 0)),
            scratch_shapes=[pltpu.VMEM((tn, C, 128), jnp.float32)],
        ),
        compiler_params=pltpu.CompilerParams(
            dimension_semantics=("parallel", "arbitrary"),
            vmem_limit_bytes=vmem_limit,
        ),
    )(x3, w1, w2)

    return out.reshape(N, C, 1, 1)


def init_params(key, in_channels):
    """Deterministic kaiming_normal_-style init (fan_in, relu gain)."""
    cr = in_channels // 16
    k1, k2 = jax.random.split(key)
    w1 = jax.random.normal(k1, (cr, in_channels), jnp.float32) * jnp.sqrt(2.0 / in_channels)
    w2 = jax.random.normal(k2, (in_channels, cr), jnp.float32) * jnp.sqrt(2.0 / cr)
    return w1, w2


def _reference(x_nchw, w1, w2):
    pooled = jnp.mean(x_nchw.astype(jnp.float32), axis=(2, 3))    # (N, C)
    h = jnp.maximum(pooled @ w1.T, 0.0)                           # (N, Cr)
    s = jax.nn.sigmoid(h @ w2.T)                                  # (N, C)
    return s[:, :, None, None]


if __name__ == "__main__":
    key = jax.random.PRNGKey(0)
    keys = jax.random.split(key, 8)

    # Case 1: small canonical f32 shape; N < 8 -> tn = N (no padded rows),
    # whole HW row streamed in a single step.
    N, C, H, W = 2, 32, 16, 16
    x = jax.random.normal(keys[0], (N, C, H, W), jnp.float32)
    w1, w2 = init_params(keys[1], C)
    out = jax.block_until_ready(se_block(x, w1, w2))
    ref = _reference(x, w1, w2)
    assert out.shape == (N, C, 1, 1)
    assert jnp.allclose(out, ref, atol=1e-5, rtol=1e-5), "case 1 mismatch"

    # Case 2: bf16 streaming, ragged N (9 -> two parallel i-tiles, partial
    # last tile) and HW = 1600 = 12*128 + 64 (remainder lane slab).
    N2, C2, H2, W2 = 9, 64, 40, 40
    x2 = jax.random.normal(keys[2], (N2, C2, H2, W2), jnp.float32).astype(jnp.bfloat16)
    w1b, w2b = init_params(keys[3], C2)
    out2 = jax.block_until_ready(se_block(x2, w1b, w2b))
    ref2 = _reference(x2, w1b, w2b)
    assert out2.shape == (N2, C2, 1, 1)
    assert jnp.allclose(out2, ref2, atol=2e-3, rtol=2e-3), "case 2 mismatch"

    # Case 3: tiny step budget forces a multi-step HW reduction with a ragged
    # (iota-masked) tail block, plus an N < 8 (full-dim) N tile.
    N3, C3, H3, W3 = 4, 32, 20, 20
    x3 = jax.random.normal(keys[4], (N3, C3, H3, W3), jnp.float32)
    w1c, w2c = init_params(keys[5], C3)
    out3 = jax.block_until_ready(se_block(x3, w1c, w2c, step_budget_bytes=160 * 1024))
    ref3 = _reference(x3, w1c, w2c)
    assert jnp.allclose(out3, ref3, atol=1e-5, rtol=1e-5), "case 3 mismatch"

    # Case 4: larger batch exercises tn growth (tn=16, two parallel i-tiles)
    # and an HW < 128 (full-dim, sub-128-lane slab) input.
    N4, C4, H4, W4 = 32, 32, 8, 8
    x4 = jax.random.normal(keys[6], (N4, C4, H4, W4), jnp.float32)
    w1d, w2d = init_params(keys[7], C4)
    out4 = jax.block_until_ready(se_block(x4, w1d, w2d))
    ref4 = _reference(x4, w1d, w2d)
    assert jnp.allclose(out4, ref4, atol=1e-5, rtol=1e-5), "case 4 mismatch"

    print("KERNEL_OK")
</pallas_src>

<mosaic_0001>
module attributes {stable_mosaic.version = 11 : i64} {
  func.func @_se_kernel(%arg0: i32, %arg1: i32, %arg2: memref<2x32x256xf32, #tpu.memory_space<vmem>>, %arg3: memref<2x32xf32, #tpu.memory_space<vmem>>, %arg4: memref<32x2xf32, #tpu.memory_space<vmem>>, %arg5: memref<2x32xf32, #tpu.memory_space<vmem>>, %arg6: memref<2x32x128xf32, #tpu.memory_space<vmem>>) attributes {dimension_semantics = [#tpu.dimension_semantics<parallel>, #tpu.dimension_semantics<arbitrary>], iteration_bounds = array<i64: 1, 1>, scalar_prefetch = 0 : i64, scratch_operands = 1 : i64, tpu.core_type = #tpu.core_type<tc>, window_params = [{transform_indices = @transform_0, window_bounds = array<i64: 2, 32, 256>}, {pipeline_mode = #tpu.pipeline_mode<synchronous>, transform_indices = @transform_1, window_bounds = array<i64: 2, 32>}, {pipeline_mode = #tpu.pipeline_mode<synchronous>, transform_indices = @transform_2, window_bounds = array<i64: 32, 2>}, {transform_indices = @transform_3, window_bounds = array<i64: 2, 32>}]} {
    %c0_i32 = arith.constant 0 : i32
    %0 = arith.cmpi eq, %arg1, %c0_i32 : i32
    %1 = arith.extui %0 : i1 to i32
    %c0_i32_0 = arith.constant 0 : i32
    %2 = arith.cmpi ne, %1, %c0_i32_0 : i32
    scf.if %2 {
      %cst = arith.constant 0.000000e+00 : f32
      %14 = vector.broadcast %cst : f32 to vector<2x32x128xf32>
      %c0_19 = arith.constant 0 : index
      %c0_20 = arith.constant 0 : index
      %c0_21 = arith.constant 0 : index
      %15 = vector.load %arg6[%c0_19, %c0_20, %c0_21] : memref<2x32x128xf32, #tpu.memory_space<vmem>>, vector<2x32x128xf32>
      tpu.vector_store %arg6[%c0_19, %c0_20, %c0_21], %14 {strides = array<i32>} : memref<2x32x128xf32, #tpu.memory_space<vmem>>, vector<2x32x128xf32>,
    } else {
    }
    %c0 = arith.constant 0 : index
    %c0_1 = arith.constant 0 : index
    %c0_2 = arith.constant 0 : index
    %3 = vector.load %arg2[%c0, %c0_1, %c0_2] : memref<2x32x256xf32, #tpu.memory_space<vmem>>, vector<2x32x128xf32>
    %c0_3 = arith.constant 0 : index
    %c0_4 = arith.constant 0 : index
    %c0_5 = arith.constant 0 : index
    %4 = vector.load %arg6[%c0_3, %c0_4, %c0_5] : memref<2x32x128xf32, #tpu.memory_space<vmem>>, vector<2x32x128xf32>
    %5 = arith.addf %4, %3 : vector<2x32x128xf32>
    %c0_6 = arith.constant 0 : index
    %c0_7 = arith.constant 0 : index
    %c0_8 = arith.constant 0 : index
    %6 = vector.load %arg6[%c0_6, %c0_7, %c0_8] : memref<2x32x128xf32, #tpu.memory_space<vmem>>, vector<2x32x128xf32>
    tpu.vector_store %arg6[%c0_6, %c0_7, %c0_8], %5 {strides = array<i32>} : memref<2x32x128xf32, #tpu.memory_space<vmem>>, vector<2x32x128xf32>,
    %c0_9 = arith.constant 0 : index
    %c0_10 = arith.constant 0 : index
    %c128 = arith.constant 128 : index
    %7 = vector.load %arg2[%c0_9, %c0_10, %c128] : memref<2x32x256xf32, #tpu.memory_space<vmem>>, vector<2x32x128xf32>
    %c0_11 = arith.constant 0 : index
    %c0_12 = arith.constant 0 : index
    %c0_13 = arith.constant 0 : index
    %8 = vector.load %arg6[%c0_11, %c0_12, %c0_13] : memref<2x32x128xf32, #tpu.memory_space<vmem>>, vector<2x32x128xf32>
    %9 = arith.addf %8, %7 : vector<2x32x128xf32>
    %c0_14 = arith.constant 0 : index
    %c0_15 = arith.constant 0 : index
    %c0_16 = arith.constant 0 : index
    %10 = vector.load %arg6[%c0_14, %c0_15, %c0_16] : memref<2x32x128xf32, #tpu.memory_space<vmem>>, vector<2x32x128xf32>
    tpu.vector_store %arg6[%c0_14, %c0_15, %c0_16], %9 {strides = array<i32>} : memref<2x32x128xf32, #tpu.memory_space<vmem>>, vector<2x32x128xf32>,
    %c0_i32_17 = arith.constant 0 : i32
    %11 = arith.cmpi eq, %arg1, %c0_i32_17 : i32
    %12 = arith.extui %11 : i1 to i32
    %c0_i32_18 = arith.constant 0 : i32
    %13 = arith.cmpi ne, %12, %c0_i32_18 : i32
    scf.if %13 {
      %c0_19 = arith.constant 0 : index
      %c0_20 = arith.constant 0 : index
      %c0_21 = arith.constant 0 : index
      %14 = vector.load %arg6[%c0_19, %c0_20, %c0_21] : memref<2x32x128xf32, #tpu.memory_space<vmem>>, vector<2x32x128xf32>
      %cst = arith.constant dense<0.000000e+00> : vector<2x32xf32>
      %15 = vector.multi_reduction <add>, %14, %cst [2] : vector<2x32x128xf32> to vector<2x32xf32>
      %cst_22 = arith.constant 3.906250e-03 : f32
      %16 = vector.broadcast %cst_22 : f32 to vector<2x32xf32>
      %17 = arith.mulf %15, %16 : vector<2x32xf32>
      %c0_23 = arith.constant 0 : index
      %c0_24 = arith.constant 0 : index
      %18 = vector.load %arg3[%c0_23, %c0_24] : memref<2x32xf32, #tpu.memory_space<vmem>>, vector<2x32xf32>
      %cst_25 = arith.constant dense<0.000000e+00> : vector<2x2xf32>
      %19 = tpu.matmul %17, %18, %cst_25 {dimension_numbers = #tpu.dot_dimension_numbers<[1], [1], [0], [0], [0, 0, 1, 0], [], []>} : vector<2x32xf32>, vector<2x32xf32>, vector<2x2xf32> -> vector<2x2xf32>
      %cst_26 = arith.constant 0.000000e+00 : f32
      %20 = vector.broadcast %cst_26 : f32 to vector<2x2xf32>
      %21 = arith.maximumf %19, %20 : vector<2x2xf32>
      %c0_27 = arith.constant 0 : index
      %c0_28 = arith.constant 0 : index
      %22 = vector.load %arg4[%c0_27, %c0_28] : memref<32x2xf32, #tpu.memory_space<vmem>>, vector<32x2xf32>
      %cst_29 = arith.constant dense<0.000000e+00> : vector<2x32xf32>
      %23 = tpu.matmul %21, %22, %cst_29 {dimension_numbers = #tpu.dot_dimension_numbers<[1], [1], [0], [0], [0, 0, 1, 0], [], []>} : vector<2x2xf32>, vector<32x2xf32>, vector<2x32xf32> -> vector<2x32xf32>
      %24 = arith.negf %23 : vector<2x32xf32>
      %25 = math.exp %24 : vector<2x32xf32>
      %cst_30 = arith.constant 1.000000e+00 : f32
      %26 = vector.broadcast %cst_30 : f32 to vector<2x32xf32>
      %27 = arith.addf %26, %25 : vector<2x32xf32>
      %28 = arith.divf %26, %27 : vector<2x32xf32>
      %c0_31 = arith.constant 0 : index
      %c0_32 = arith.constant 0 : index
      %29 = vector.load %arg5[%c0_31, %c0_32] : memref<2x32xf32, #tpu.memory_space<vmem>>, vector<2x32xf32>
      tpu.vector_store %arg5[%c0_31, %c0_32], %28 {strides = array<i32>} : memref<2x32xf32, #tpu.memory_space<vmem>>, vector<2x32xf32>,
    } else {
    }
    return
  }
  func.func @transform_0(%arg0: i32, %arg1: i32) -> (i32, i32, i32) {
    %c0_i32 = arith.constant 0 : i32
    %c0_i32_0 = arith.constant 0 : i32
    return %arg0, %c0_i32, %arg1 : i32, i32, i32
  }
  func.func @transform_1(%arg0: i32, %arg1: i32) -> (i32, i32) {
    %c0_i32 = arith.constant 0 : i32
    %c0_i32_0 = arith.constant 0 : i32
    %c0_i32_1 = arith.constant 0 : i32
    return %c0_i32, %c0_i32_0 : i32, i32
  }
  func.func @transform_2(%arg0: i32, %arg1: i32) -> (i32, i32) {
    %c0_i32 = arith.constant 0 : i32
    %c0_i32_0 = arith.constant 0 : i32
    %c0_i32_1 = arith.constant 0 : i32
    return %c0_i32, %c0_i32_0 : i32, i32
  }
  func.func @transform_3(%arg0: i32, %arg1: i32) -> (i32, i32) {
    %c0_i32 = arith.constant 0 : i32
    %c0_i32_0 = arith.constant 0 : i32
    return %arg0, %c0_i32 : i32, i32
  }
}

</mosaic_0001>

<bundles_post_ra>
// kernel: tpu_custom_call.1
= control target key start
LH: loop header
LB: loop body
LE: loop exit
PB: predicated region body
PF: predicated region fallthrough
CT: control target
= control target key end

     0   :  { %8 = vsyncpa [#allocation4], 0  ;;  %s526_s0 = inlined_call_operand.hbm [shape: f32[2,32,256], index: 0, kind: input, shape index: {}]   ;;  %s527_s1 = inlined_call_operand.vmem [shape: f32[2,32], index: 1, kind: input, shape index: {}]   ;;  %s528_s2 = inlined_call_operand.vmem [shape: f32[32,2], index: 2, kind: input, shape index: {}]   ;;  %s529_s3 = inlined_call_operand.hbm [shape: f32[2,32], index: 3, kind: output, shape index: {}]  }
   0x1   :  { %9 = vsyncpa [#allocation5], 0  ;;  %s472_s12 = smov [#allocation3]  }
   0x2   :  { %s15_s13 = sshll.u32 %s472_s12, 4  ;;  %s16_s13 = int_to_ptr.vmem [resolvable:$true] %s15_s13 }
   0x3   :  { %s436_s14 = scalar_lea.vmem %s16_s13, 2048  ;;  %p441_p1 = scmp.lt.s32.totalorder %s16_s13, %s16_s13 }
   0x4   :  { %p437_p0 = scmp.ne.s32.totalorder %s16_s13, %s436_s14  ;;  %p442_p2 = scmp.lt.s32.totalorder %s436_s14, %s436_s14 }
   0x6   :  { %p443_p3 = por %p442_p2, %p441_p1 }
   0x8   :  { %p444_p4 = pnand %p443_p3, %p437_p0 }
   0xa   :  { %447 = shalt.err (!%p444_p4)
}
   0xb   :  { %s473_s15 = smov 256   ;;  %s474_s16 = smov 16  }
   0xc   :  { %21 = dma.hbm_to_vmem [thread:$0]  %s526_s0, 2048, %s16_s13, [#allocation4], %s473_s15, %s473_s15, %s474_s16  }
   0xd   :  { %468 = dma.done.wait [#allocation4], 2048  }
   0xe   :  { %469 = vsyncadd [#allocation4], 4294965248  ;;  %v45_v0 = vld [vmem:[#allocation3 + $0x40] sm:$0xff]  ;;  %v77_v1 = vld [vmem:[#allocation3 + $0x48] sm:$0xff]  ;;  %v475_v24 = vmov 0.0   ;;  %vm197_vm0 = vcmask 261120   ;;  %v149_v29 = vlaneseq }
   0xf   :  { %v41_v2 = vld [vmem:[#allocation3] sm:$0xff]  ;;  %v93_v3 = vadd.f32 %v77_v1, %v45_v0  ;;  %v73_v4 = vld [vmem:[#allocation3 + $0x8] sm:$0xff]  ;;  %v46_v5 = vld [vmem:[#allocation3 + $0x50] sm:$0xff]  ;;  %402 = vmatprep.subr.mxu0 %v475_v24  ;;  %407 = vmatprep.subr.mxu1 %v475_v24  ;;  %vm476_vm1 = vmmov 0   ;;  %vm278_vm2 = vcmask 15360   ;;  %vm160_vm3 = vcmask 130112  }
  0x10   :  { %v78_v6 = vld [vmem:[#allocation3 + $0x58] sm:$0xff]  ;;  %v89_v7 = vadd.f32 %v73_v4, %v41_v2  ;;  %v42_v8 = vld [vmem:[#allocation3 + $0x10] sm:$0xff]  ;;  %v47_v12 = vld [vmem:[#allocation3 + $0x60] sm:$0xff]  ;;  %404 = vmatprep.mubr.msk.f32.mxu0 %vm476_vm1, %v475_v24  ;;  %415 = vmatprep.mubr.msk.f32.mxu1 %vm476_vm1, %v475_v24  ;;  %v150_v31 = vand.u32 127, %v149_v29  ;;  %v152_v36 = vshrl.u32 %v149_v29, 7  ;;  %vm167_vm4 = vcmask 195712  }
  0x11   :  { %v74_v9 = vld [vmem:[#allocation3 + $0x18] sm:$0xff]  ;;  %124 = vadd.xlane.f32.xlu1 %v93_v3  ;;  %v94_v10 = vadd.f32 %v78_v6, %v46_v5  ;;  %v79_v13 = vld [vmem:[#allocation3 + $0x68] sm:$0xff]  ;;  %v43_v14 = vld [vmem:[#allocation3 + $0x20] sm:$0xff]  ;;  %vm174_vm5 = vcmask 261312   ;;  %vm195_vm6 = vcmask 1041409   ;;  %s477_s27 = smov [#allocation6]  }
  0x12   :  { %116 = vadd.xlane.f32.xlu0 %v89_v7  ;;  %v90_v11 = vadd.f32 %v74_v9, %v42_v8  ;;  %v75_v15 = vld [vmem:[#allocation3 + $0x28] sm:$0xff]  ;;  %v95_v16 = vadd.f32 %v79_v13, %v47_v12  ;;  %v48_v18 = vld [vmem:[#allocation3 + $0x70] sm:$0xff]  ;;  %v80_v19 = vld [vmem:[#allocation3 + $0x78] sm:$0xff]  ;;  %v155_v33 = vadd.s32 4294967288, %v150_v31  ;;  %v162_v35 = vadd.s32 4294967280, %v150_v31  ;;  %s378_s28 = sshll.u32 %s477_s27, 4  ;;  %s379_s28 = int_to_ptr.vmem [resolvable:$true] %s378_s28 }
  0x13   :  { %v91_v17 = vadd.f32 %v75_v15, %v43_v14  ;;  %v44_v20 = vld [vmem:[#allocation3 + $0x30] sm:$0xff]  ;;  %v76_v21 = vld [vmem:[#allocation3 + $0x38] sm:$0xff]  ;;  %v96_v22 = vadd.f32 %v80_v19, %v48_v18  ;;  %v140_v25 = vld [vmem:[%s527_s1] sm:$0x3]  ;;  %v169_v40 = vadd.s32 4294967272, %v150_v31  ;;  %v153_v44 = vsub.s32 %v150_v31, %v152_v36  ;;  %p453_p6 = scmp.lt.s32.totalorder %s379_s28, %s379_s28 }
  0x14   :  { %v92_v23 = vadd.f32 %v76_v21, %v44_v20  ;;  %403 = vmatpush3.xpose.msk.msra.mxu0 %vm197_vm0, %v140_v25  ;;  %v277_v26 = vld [vmem:[%s528_s2 + $0x18] sm:$0xff]  ;;  %v276_v27 = vld [vmem:[%s528_s2 + $0x10] sm:$0xff]  ;;  %v275_v28 = vld [vmem:[%s528_s2 + $0x8] sm:$0xff]  ;;  %v158_v38 = vsub.s32 %v155_v33, %v152_v36  ;;  %v165_v42 = vsub.s32 %v162_v35, %v152_v36  ;;  %vm370_vm7 = vcmask 254976  }
  0x15   :  { %126 = vadd.xlane.f32.xlu1 %v94_v10  ;;  %408 = vmatpush3.xpose.msk.msra.mxu1 %vm278_vm2, %v277_v26  ;;  %v172_v51 = vsub.s32 %v169_v40, %v152_v36  ;;  %v274_v6 = vld [vmem:[%s528_s2] sm:$0xff]  ;;  %s448_s2 = scalar_lea.vmem %s379_s28, 32 }
  0x16   :  { %118 = vadd.xlane.f32.xlu0 %v90_v11  ;;  %409 = vmatprep.subr.mxu1 %v475_v24  ;;  %p449_p5 = scmp.ne.s32.totalorder %s379_s28, %s448_s2  ;;  %p454_p7 = scmp.lt.s32.totalorder %s448_s2, %s448_s2 }
  0x18   :  { %p455_p8 = por %p454_p7, %p453_p6 }
  0x19   :  { %128 = vadd.xlane.f32.xlu1 %v95_v16  ;;  %410 = vmatpush3.xpose.msk.msra.mxu1 %vm278_vm2, %v276_v27 }
  0x1a   :  { %120 = vadd.xlane.f32.xlu0 %v91_v17  ;;  %411 = vmatprep.subr.mxu1 %v475_v24  ;;  %p456_p9 = pnand %p455_p8, %p449_p5 }
  0x1d   :  { %130 = vadd.xlane.f32.xlu1 %v96_v22  ;;  %412 = vmatpush3.xpose.msk.msra.mxu1 %vm278_vm2, %v275_v28 }
  0x1e   :  { %122 = vadd.xlane.f32.xlu0 %v92_v23  ;;  %413 = vmatprep.subr.mxu1 %v475_v24 }
  0x21   :  { %414 = vmatpush3.xpose.msk.msra.mxu1 %vm278_vm2, %v274_v6 }
  0x9a   :  { %v125_v30 = vpop.xlane.xlu1 %124 }
  0x9b   :  { %v117_v32 = vpop.xlane.xlu0 %116  ;;  %v136_v45 = vmul.f32 0.00390625, %v125_v30 }
  0x9c   :  { %v132_v48 = vmul.f32 0.00390625, %v117_v32 }
  0x9d   :  { %v179_v55 = vrot.slane %v136_v45, %v153_v44 }
  0x9e   :  { %v127_v34 = vpop.xlane.xlu1 %126  ;;  %v154_v59 = vrot.slane %v132_v48, %v153_v44 }
  0x9f   :  { %v119_v37 = vpop.xlane.xlu0 %118  ;;  %v137_v39 = vmul.f32 0.00390625, %v127_v34 }
  0xa0   :  { %v133_v41 = vmul.f32 0.00390625, %v119_v37 }
  0xa1   :  { %v183_v50 = vrot.slane %v137_v39, %v158_v38 }
  0xa2   :  { %v129_v43 = vpop.xlane.xlu1 %128  ;;  %v159_v52 = vrot.slane %v133_v41, %v158_v38 }
  0xa3   :  { %v138_v46 = vmul.f32 0.00390625, %v129_v43  ;;  %v121_v47 = vpop.xlane.xlu0 %120  ;;  %v184_v61 = vsel %vm160_vm3, %v183_v50, %v179_v55 }
  0xa4   :  { %v134_v49 = vmul.f32 0.00390625, %v121_v47  ;;  %v161_v63 = vsel %vm160_vm3, %v159_v52, %v154_v59 }
  0xa5   :  { %v188_v53 = vrot.slane %v138_v46, %v165_v42 }
  0xa6   :  { %v131_v54 = vpop.xlane.xlu1 %130  ;;  %v166_v56 = vrot.slane %v134_v49, %v165_v42 }
  0xa7   :  { %v139_v57 = vmul.f32 0.00390625, %v131_v54  ;;  %v123_v58 = vpop.xlane.xlu0 %122  ;;  %v189_v0 = vsel %vm167_vm4, %v188_v53, %v184_v61 }
  0xa8   :  { %v135_v60 = vmul.f32 0.00390625, %v123_v58  ;;  %v168_v2 = vsel %vm167_vm4, %v166_v56, %v161_v63 }
  0xa9   :  { %v193_v62 = vrot.slane %v139_v57, %v172_v51 }
  0xaa   :  { %v173_v1 = vrot.slane %v135_v60, %v172_v51 }
  0xab   :  { %v194_v3 = vsel %vm174_vm5, %v193_v62, %v189_v0 }
  0xac   :  { %v175_v4 = vsel %vm174_vm5, %v173_v1, %v168_v2 }
  0xad   :  { %v196_v5 = vsel %vm195_vm6, %v194_v3, %v175_v4 }
  0xae   :  { %405 = vmatmul.mubr.msk.f32.vlgmr.msra.gmra.mxu0 %vm197_vm0, %v196_v5 }
 0x16e   :  { %v269_v7 = vpop.f32.mrf.mxu0 }
 0x16f   :  { %v273_v8 = vmax.f32 %v269_v7, 0.0 }
 0x170   :  { %v406_v9 = vpop.f32.mrf.mxu0 }
 0x171   :  { %416 = vmatmul.mubr.msk.f32.vlgmr.msra.gmra.mxu1 %vm278_vm2, %v273_v8 }
 0x231   :  { %v360_v10 = vpop.f32.mrf.mxu1 }
 0x232   :  { %v394_v11 = vmul.f32 -1.442695, %v360_v10 }
 0x233   :  { %v417_v12 = vpop.f32.mrf.mxu1 }
 0x234   :  { %424 = vpow2.f32 %v394_v11 }
 0x241   :  { %v425_v13 = vpop.eup %424 }
 0x242   :  { %v367_v14 = vadd.f32 1.0, %v425_v13 }
 0x244   :  { %426 = vrcp.f32 %v367_v14 }
 0x251   :  { %v427_v15 = vpop.eup %426 }
 0x252   :  { %371 = vst.msk [vmem:[#allocation6] sm:$0x3] %vm370_vm7, %v427_v15 }
 0x253   :  { %459 = shalt.err (!%p456_p9)
}
 0x254   :  { %381 = dma.vmem_to_hbm [thread:$0]  %s379_s28, 32, %s529_s3, [#allocation5]  }
 0x255   :  { %470 = dma.done.wait [#allocation5], 32  }
 0x256   :  { %471 = vsyncadd [#allocation5], 4294967264 }
 0x257   :  { %385 = vsyncpa [#allocation4], 1 }
 0x258   :  { %386 = vsyncpa [#allocation5], 1 }

</bundles_post_ra>
